<compile_context>
chip_gen: v5e
topology: v5e:2x2
jax: 0.10.0
libtpu: 0.0.40
codegen_flags: <defaults>
</compile_context>

<pallas_src>
import functools

import numpy as np
import jax
import jax.numpy as jnp
from jax.experimental import pallas as pl
from jax.experimental.pallas import tpu as pltpu

LANE = 128
# Explicit scoped-VMEM budget (raises the 16 MiB v5e default; default on v6e/v7x).
# For very large N, raise this and/or shrink row_tile.
_VMEM_LIMIT = 32 * 1024 * 1024


# ----------------------------------------------------------------------------
# helpers
# ----------------------------------------------------------------------------
def _round_up(n, m):
    return ((n + m - 1) // m) * m


def _tile_cfg(n, row_tile):
    """Row-tile size (multiple of 16, bf16-safe) and padded node count."""
    tm = max(16, min(_round_up(row_tile, 16), _round_up(n, 16)))
    return _round_up(n, tm), tm


def _pad2(a, rows, cols):
    a = np.asarray(a, np.float32)
    return np.pad(a, ((0, rows - a.shape[0]), (0, cols - a.shape[1])))


def _cparams(parallel=0, arbitrary=0):
    return pltpu.CompilerParams(
        dimension_semantics=("parallel",) * parallel + ("arbitrary",) * arbitrary,
        vmem_limit_bytes=_VMEM_LIMIT)


# ----------------------------------------------------------------------------
# Kernel 1: GINConv(eps=0) + 3-layer MLP (BatchNorm already folded into w/b).
#   h   = x_tile + adj_tile @ x_full                (GIN sum aggregation)
#   out = relu(fc3(relu(fc2(relu(fc1(h))))))        (Dropout = identity in eval)
# Row-tiled over nodes; adjacency is bf16 in HBM, all feature math in f32.
# TODO(synk): fusing gc1..gc3 into one adjacency pass is not possible in
# general (each layer's aggregation needs the previous layer's features for
# ALL nodes), so adjacency is re-read once per layer (halved by bf16 storage).
# ----------------------------------------------------------------------------
def _gin_mlp_kernel(din_one, xf_ref, xt_ref, adj_ref,
                    w1_ref, b1_ref, w2_ref, b2_ref, w3_ref, b3_ref, o_ref):
    adj = adj_ref[...].astype(jnp.float32)                       # [TM, NP]
    h = xt_ref[...] + jnp.dot(adj, xf_ref[...],
                              preferred_element_type=jnp.float32)
    if din_one:
        # K=1 "matmul" done on the VPU as a broadcast multiply (keeps MXU free).
        z = h * w1_ref[...] + b1_ref[...]
    else:
        z = jnp.dot(h, w1_ref[...], preferred_element_type=jnp.float32) + b1_ref[...]
    z = jnp.maximum(z, 0.0)
    z = jnp.dot(z, w2_ref[...], preferred_element_type=jnp.float32) + b2_ref[...]
    z = jnp.maximum(z, 0.0)
    z = jnp.dot(z, w3_ref[...], preferred_element_type=jnp.float32) + b3_ref[...]
    o_ref[...] = jnp.maximum(z, 0.0)                             # MLP ends in F.relu(fc3)


def gin_mlp(x, adj_bf16, p, tm, din_one=False):
    n_pad = adj_bf16.shape[0]
    d = x.shape[1]
    dout = p["w3"].shape[1]
    ws = [p["w1"], p["b1"], p["w2"], p["b2"], p["w3"], p["b3"]]
    in_specs = [
        pl.BlockSpec((n_pad, d), lambda i: (0, 0)),    # x full (for aggregation)
        pl.BlockSpec((tm, d), lambda i: (i, 0)),       # x row tile (self term)
        pl.BlockSpec((tm, n_pad), lambda i: (i, 0)),   # adjacency row tile (bf16)
    ] + [pl.BlockSpec(w.shape, lambda i: (0, 0)) for w in ws]
    return pl.pallas_call(
        functools.partial(_gin_mlp_kernel, din_one),
        grid=(n_pad // tm,),
        in_specs=in_specs,
        out_specs=pl.BlockSpec((tm, dout), lambda i: (i, 0)),
        out_shape=jax.ShapeDtypeStruct((n_pad, dout), jnp.float32),
        compiler_params=_cparams(parallel=1),
    )(x, x, adj_bf16, *ws)


# ----------------------------------------------------------------------------
# Kernel 2a: MEWISPool entropy, stage 1 (row-tiled):
#   V = x*(Lx) - x*(Ax) + A(x*x) = deg*x^2 - 2*x*(Ax) + A(x^2);  v = ||V||_row
# x^2 is computed in-kernel on the VPU (no extra [N, 2H] HBM array).
# ----------------------------------------------------------------------------
def _entropy_v_kernel(xf_ref, xt_ref, adj_ref, deg_ref, o_ref):
    adj = adj_ref[...].astype(jnp.float32)                       # [TM, NP]
    xf = xf_ref[...]                                             # [NP, H]
    ax = jnp.dot(adj, xf, preferred_element_type=jnp.float32)
    axx = jnp.dot(adj, xf * xf, preferred_element_type=jnp.float32)
    xt = xt_ref[...]
    v = deg_ref[...] * (xt * xt) - 2.0 * xt * ax + axx
    o_ref[...] = jnp.sqrt(jnp.sum(v * v, axis=1, keepdims=True))


def entropy_v(x, adj_bf16, deg, tm):
    n_pad = adj_bf16.shape[0]
    h = x.shape[1]
    in_specs = [
        pl.BlockSpec((n_pad, h), lambda i: (0, 0)),
        pl.BlockSpec((tm, h), lambda i: (i, 0)),
        pl.BlockSpec((tm, n_pad), lambda i: (i, 0)),
        pl.BlockSpec((tm, 1), lambda i: (i, 0)),
    ]
    return pl.pallas_call(
        _entropy_v_kernel,
        grid=(n_pad // tm,),
        in_specs=in_specs,
        out_specs=pl.BlockSpec((tm, 1), lambda i: (i, 0)),
        out_shape=jax.ShapeDtypeStruct((n_pad, 1), jnp.float32),
        compiler_params=_cparams(parallel=1),
    )(x, x, adj_bf16, deg)


# ----------------------------------------------------------------------------
# Kernel 2b: entropy stage 2 (tiny, whole-array): per-graph masked softmax and
#            H = -P log P (reference: P[P==0] += 1). Padded rows -> 0.
# ----------------------------------------------------------------------------
def _entropy_h_kernel(v_ref, mt_ref, o_ref):
    v = v_ref[...]                                               # [NP, 1]
    mt = mt_ref[...]                                             # [NP, B]
    vb = jnp.where(mt > 0, v, jnp.float32(-1e30))
    maxg = jnp.max(vb, axis=0, keepdims=True)                    # [1, B]
    node_max = jnp.sum(mt * maxg, axis=1, keepdims=True)         # [NP, 1]
    e = jnp.exp(v - node_max)
    sumg = jnp.sum(mt * e, axis=0, keepdims=True)                # [1, B]
    node_sum = jnp.sum(mt * sumg, axis=1, keepdims=True)         # [NP, 1]
    p = e / jnp.where(node_sum > 0, node_sum, 1.0)
    p = jnp.where(p == 0.0, jnp.float32(1.0), p)
    h = -p * jnp.log(p)
    valid = jnp.sum(mt, axis=1, keepdims=True) > 0
    o_ref[...] = jnp.where(valid, h, 0.0)


def entropy_h(v, mt):
    n_pad, b = mt.shape
    return pl.pallas_call(
        _entropy_h_kernel,
        grid=(1,),
        in_specs=[pl.BlockSpec((n_pad, 1), lambda i: (0, 0)),
                  pl.BlockSpec((n_pad, b), lambda i: (0, 0))],
        out_specs=pl.BlockSpec((n_pad, 1), lambda i: (0, 0)),
        out_shape=jax.ShapeDtypeStruct((n_pad, 1), jnp.float32),
        compiler_params=_cparams(arbitrary=1),
    )(v, mt)


# ----------------------------------------------------------------------------
# Kernel 3: per-graph mean readout (tiny: B x N membership matmul).
# ----------------------------------------------------------------------------
def _segmean_kernel(m_ref, x_ref, o_ref):
    m = m_ref[...]
    s = jnp.dot(m, x_ref[...], preferred_element_type=jnp.float32)
    cnt = jnp.maximum(jnp.sum(m, axis=1, keepdims=True), 1.0)
    o_ref[...] = s / cnt


def segment_mean(m, x):
    b, n_pad = m.shape
    d = x.shape[1]
    return pl.pallas_call(
        _segmean_kernel,
        grid=(1,),
        in_specs=[pl.BlockSpec((b, n_pad), lambda i: (0, 0)),
                  pl.BlockSpec((n_pad, d), lambda i: (0, 0))],
        out_specs=pl.BlockSpec((b, d), lambda i: (0, 0)),
        out_shape=jax.ShapeDtypeStruct((b, d), jnp.float32),
        compiler_params=_cparams(arbitrary=1),
    )(m, x)


# ----------------------------------------------------------------------------
# Kernel 4: fused pooled-adjacency pre-product (row-tiled):
#   out = (1 - I) * clip(A^2 + A^3, 0, 1)   -- only the 0/1 pattern is consumed
# bf16 x bf16 MXU with f32 accumulation; rounding of large path counts cannot
# flip zero/non-zero, which is all clip()/ ">0" keeps, so the bf16 output
# (exact for 0/1) halves the writeback and the device->host transfer.
# ----------------------------------------------------------------------------
def _adjpow_kernel(tm, af_ref, at_ref, o_ref):
    i = pl.program_id(0)
    af = af_ref[...]                                             # bf16 [NP, NP]
    a2 = jnp.dot(at_ref[...], af, preferred_element_type=jnp.float32)
    a3 = jnp.dot(a2.astype(jnp.bfloat16), af, preferred_element_type=jnp.float32)
    s = jnp.clip(a2 + a3, 0.0, 1.0)
    rows = jax.lax.broadcasted_iota(jnp.int32, s.shape, 0) + i * tm
    cols = jax.lax.broadcasted_iota(jnp.int32, s.shape, 1)
    o_ref[...] = jnp.where(rows == cols, 0.0, s).astype(o_ref.dtype)


def adj_pow23(adj_bf16, tm):
    n_pad = adj_bf16.shape[0]
    return pl.pallas_call(
        functools.partial(_adjpow_kernel, tm),
        grid=(n_pad // tm,),
        in_specs=[pl.BlockSpec((n_pad, n_pad), lambda i: (0, 0)),
                  pl.BlockSpec((tm, n_pad), lambda i: (i, 0))],
        out_specs=pl.BlockSpec((tm, n_pad), lambda i: (i, 0)),
        out_shape=jax.ShapeDtypeStruct((n_pad, n_pad), jnp.bfloat16),
        compiler_params=_cparams(parallel=1),
    )(adj_bf16, adj_bf16)


# ----------------------------------------------------------------------------
# Kernel 5: classification head  fc1 -> relu -> fc2 -> log_softmax
# (fc2 is lane-padded to 128 outputs with zero weights and -1e9 bias so the
#  padded logits vanish from the softmax; sliced back in the wrapper.)
# ----------------------------------------------------------------------------
def _head_kernel(x_ref, w1_ref, b1_ref, w2_ref, b2_ref, o_ref):
    z = jnp.dot(x_ref[...], w1_ref[...], preferred_element_type=jnp.float32) + b1_ref[...]
    z = jnp.maximum(z, 0.0)
    logits = jnp.dot(z, w2_ref[...], preferred_element_type=jnp.float32) + b2_ref[...]
    m = jnp.max(logits, axis=-1, keepdims=True)
    lse = jnp.log(jnp.sum(jnp.exp(logits - m), axis=-1, keepdims=True)) + m
    o_ref[...] = logits - lse


def head(x, w1, b1, w2p, b2p):
    b = x.shape[0]
    cp = w2p.shape[1]
    args = [x, w1, b1, w2p, b2p]
    return pl.pallas_call(
        _head_kernel,
        grid=(1,),
        in_specs=[pl.BlockSpec(a.shape, lambda i: (0, 0)) for a in args],
        out_specs=pl.BlockSpec((b, cp), lambda i: (0, 0)),
        out_shape=jax.ShapeDtypeStruct((b, cp), jnp.float32),
        compiler_params=_cparams(arbitrary=1),
    )(*args)


# ----------------------------------------------------------------------------
# Parameter construction (deterministic synthetic weights; eval-mode BatchNorm
# folded into fc1/fc2; optional lane padding of the output layer).
# ----------------------------------------------------------------------------
def make_gin_params(key, din, hid, dout, enhance, pad_out_to=None):
    ks = jax.random.split(key, 14)

    def lin(ka, kb, i, o):
        w = 0.1 * jax.random.normal(ka, (i, o), jnp.float32)
        b = 0.1 * jax.random.normal(kb, (1, o), jnp.float32)
        return w, b

    w1, b1 = lin(ks[0], ks[1], din, hid)
    w2, b2 = lin(ks[2], ks[3], hid, hid)
    w3, b3 = lin(ks[4], ks[5], hid, dout)
    if enhance:
        def bn(kg, kbeta, km, kv):
            g = 1.0 + 0.1 * jax.random.normal(kg, (1, hid), jnp.float32)
            beta = 0.1 * jax.random.normal(kbeta, (1, hid), jnp.float32)
            mean = 0.1 * jax.random.normal(km, (1, hid), jnp.float32)
            var = 1.0 + 0.1 * jnp.abs(jax.random.normal(kv, (1, hid), jnp.float32))
            return g, beta, mean, var

        g1, be1, m1, v1 = bn(ks[6], ks[7], ks[8], ks[9])
        g2, be2, m2, v2 = bn(ks[10], ks[11], ks[12], ks[13])
        s1 = g1 * jax.lax.rsqrt(v1 + 1e-5)
        w1, b1 = w1 * s1, (b1 - m1) * s1 + be1            # fold bn1 into fc1
        s2 = g2 * jax.lax.rsqrt(v2 + 1e-5)
        w2, b2 = w2 * s2, (b2 - m2) * s2 + be2            # fold bn2 into fc2
    if pad_out_to is not None and dout < pad_out_to:
        w3 = jnp.pad(w3, ((0, 0), (0, pad_out_to - dout)))
        b3 = jnp.pad(b3, ((0, 0), (0, pad_out_to - dout)))
    return dict(w1=w1, b1=b1, w2=w2, b2=b2, w3=w3, b3=b3)


# ----------------------------------------------------------------------------
# Host-side (data-dependent) pieces of MEWISPool
# ----------------------------------------------------------------------------
def loss_fn_np(ent, prob, A, gamma):
    term1 = -float(ent[:, 0] @ prob[:, 0])
    term2 = float(prob[:, 0] @ A @ prob[:, 0])
    return float(gamma) + term1 + term2


def conditional_expectation_np(ent, prob, A, threshold, gamma):
    # TODO(synk): sequential greedy MIS selection over Python sets is inherently
    # data-dependent host logic; no clean Pallas equivalent.
    order = np.argsort(-prob[:, 0])
    dummy = prob.copy()
    selected, rejected = set(), set()
    for idx in order:
        node = int(idx)
        neighbors = np.where(A[node] == 1)[0]
        if len(neighbors) == 0:
            selected.add(node)
            continue
        if node not in rejected and node not in selected:
            s = dummy.copy()
            s[node] = 1.0
            s[neighbors] = 0.0
            if loss_fn_np(ent, s, A, gamma) <= threshold:
                selected.add(node)
                rejected.update(int(n) for n in neighbors)
                dummy[node] = 1.0
                dummy[neighbors] = 0.0
    return sorted(selected)


# ----------------------------------------------------------------------------
# Full Net2 forward
# ----------------------------------------------------------------------------
def net2_forward(params, x_np, agg_np, batch_np, num_graphs, num_classes,
                 row_tile=512):
    N, D = x_np.shape
    n_pad, tm = _tile_cfg(N, row_tile)

    A_np = np.asarray(agg_np, np.float64)                 # host copy (loss / greedy MIS)
    A_pad = _pad2(agg_np, n_pad, n_pad)
    adj_dev = jnp.asarray(A_pad, jnp.bfloat16)            # bf16 adjacency in HBM
    deg_dev = jnp.asarray(A_pad.sum(axis=1, keepdims=True), jnp.float32)
    x_dev = jnp.asarray(_pad2(x_np, n_pad, D), jnp.float32)

    M_np = np.zeros((num_graphs, n_pad), np.float32)
    M_np[batch_np, np.arange(N)] = 1.0
    M_dev = jnp.asarray(M_np)
    Mt_dev = jnp.asarray(M_np.T)

    # --- gc1..gc3 (GIN + BN-folded MLP). The kernel already applies the MLP's
    # final ReLU, so Net2.forward's extra relu (relu of relu) is dropped.
    h = gin_mlp(x_dev, adj_dev, params["gc1"], tm)
    h = gin_mlp(h, adj_dev, params["gc2"], tm)
    h = gin_mlp(h, adj_dev, params["gc3"], tm)

    readout2 = segment_mean(M_dev, h)                            # [B, H]

    # --- MEWISPool entropies (Laplacian eliminated; x^2 computed in-kernel) ---
    v = entropy_v(h, adj_dev, deg_dev, tm)                       # [NP, 1]
    ent = entropy_h(v, Mt_dev)                                   # [NP, 1]

    pr = gin_mlp(ent, adj_dev, params["pool_gc1"], tm, din_one=True)
    pr = gin_mlp(pr, adj_dev, params["pool_gc2"], tm)
    pr3 = gin_mlp(pr, adj_dev, params["pool_gc3"], tm)           # [NP, 128] lane-padded
    prob = jax.nn.sigmoid(pr3[:, :1])                            # [NP, 1]

    a23 = adj_pow23(adj_dev, tm)                                 # (1-I)*clip(A^2+A^3,0,1), bf16

    # --- single host synchronization for everything the greedy MIS needs ---
    ent_h, prob_h, feat_h, a23_h = jax.device_get((ent, prob, h, a23))
    ent_np = np.asarray(ent_h, np.float64)[:N]
    prob_np = np.asarray(prob_h, np.float64)[:N]
    feat_np = np.asarray(feat_h, np.float32)[:N]
    a23_np = np.asarray(a23_h).astype(np.float32)[:N, :N]

    gamma = float(ent_np.sum())
    loss1 = loss_fn_np(ent_np, prob_np, A_np, gamma)
    mewis = conditional_expectation_np(ent_np, prob_np, A_np, loss1, gamma)

    # graph_reconstruction / to_edge_index (dynamic-size host indexing)
    k = len(mewis)
    adj_pooled = a23_np[np.ix_(mewis, mewis)]                    # already (1-I)*clip(...)
    agg_pooled = (adj_pooled > 0).astype(np.float32).T           # symmetric 0/1
    batch_pooled = np.asarray(batch_np)[mewis]

    k_pad, tmk = _tile_cfg(k, row_tile)
    xp_dev = jnp.asarray(_pad2(feat_np[mewis], k_pad, feat_np.shape[1]), jnp.float32)
    aggp_dev = jnp.asarray(_pad2(agg_pooled, k_pad, k_pad), jnp.bfloat16)

    # --- gc4 on the pooled graph ---
    xp = gin_mlp(xp_dev, aggp_dev, params["gc4"], tmk)           # [KP, H]

    Mp_np = np.zeros((num_graphs, k_pad), np.float32)
    Mp_np[batch_pooled, np.arange(k)] = 1.0
    readout = segment_mean(jnp.asarray(Mp_np), xp)               # [B, H]

    # --- classification head ---
    out = readout2 + readout
    logp = head(out, params["fc1_w"], params["fc1_b"],
                params["fc2_wp"], params["fc2_bp"])
    return logp[:, :num_classes], np.float32(loss1), mewis


# ----------------------------------------------------------------------------
# Demo
# ----------------------------------------------------------------------------
if __name__ == "__main__":
    input_dim, hidden_dim, num_classes = 16, 32, 4
    B = 2
    nodes_per_graph = 20                       # 19-node ring + 1 isolated node
    N = B * nodes_per_graph

    edges = []
    for base in (0, nodes_per_graph):
        ring = list(range(base, base + nodes_per_graph - 1))
        for a, b in zip(ring, ring[1:] + ring[:1]):
            edges.append((a, b))
            edges.append((b, a))
    edge_index = np.array(edges, dtype=np.int32).T               # [2, 76]
    batch_np = np.repeat(np.arange(B, dtype=np.int32), nodes_per_graph)

    # dense GIN aggregation matrix: agg[target, source] += 1
    agg_np = np.zeros((N, N), np.float32)
    np.add.at(agg_np, (edge_index[1], edge_index[0]), 1.0)

    key = jax.random.PRNGKey(0)
    kx, k1, k2, k3, k4, kp1, kp2, kp3, kf1, kf2 = jax.random.split(key, 10)
    x = np.asarray(jax.random.normal(kx, (N, input_dim), jnp.float32))

    params = {
        "gc1": make_gin_params(k1, input_dim, hidden_dim, hidden_dim, True),
        "gc2": make_gin_params(k2, hidden_dim, hidden_dim, hidden_dim, True),
        "gc3": make_gin_params(k3, hidden_dim, hidden_dim, hidden_dim, True),
        "gc4": make_gin_params(k4, hidden_dim, hidden_dim, hidden_dim, True),
        "pool_gc1": make_gin_params(kp1, 1, hidden_dim, hidden_dim, False),
        "pool_gc2": make_gin_params(kp2, hidden_dim, hidden_dim, hidden_dim, False),
        "pool_gc3": make_gin_params(kp3, hidden_dim, hidden_dim, 1, False,
                                    pad_out_to=LANE),
        "fc1_w": 0.1 * jax.random.normal(kf1, (hidden_dim, hidden_dim), jnp.float32),
        "fc1_b": jnp.zeros((1, hidden_dim), jnp.float32),
    }
    fc2_w = 0.1 * jax.random.normal(kf2, (hidden_dim, num_classes), jnp.float32)
    fc2_b = jnp.zeros((1, num_classes), jnp.float32)
    # lane-pad the classifier: zero weight columns + -1e9 bias for pad logits.
    params["fc2_wp"] = jnp.pad(fc2_w, ((0, 0), (0, LANE - num_classes)))
    params["fc2_bp"] = jnp.pad(fc2_b, ((0, 0), (0, LANE - num_classes)),
                               constant_values=-1e9)

    # row_tile=16 deliberately exercises the padded, multi-tile pipelined path
    # (N=40 -> NP=48, 3 row tiles). Use row_tile=512 for large graphs.
    logp, loss1, mewis = net2_forward(params, x, agg_np, batch_np, B, num_classes,
                                      row_tile=16)
    logp = jax.block_until_ready(logp)
    assert logp.shape == (B, num_classes)
    assert bool(jnp.all(jnp.isfinite(logp)))
    assert np.isfinite(float(loss1))
    assert len(mewis) >= 1
    print("KERNEL_OK")
</pallas_src>

<mosaic_0001>
module attributes {stable_mosaic.version = 11 : i64} {
  func.func @_gin_mlp_kernel(%arg0: i32, %arg1: memref<48x16xf32, #tpu.memory_space<vmem>>, %arg2: memref<16x16xf32, #tpu.memory_space<vmem>>, %arg3: memref<16x48xbf16, #tpu.memory_space<vmem>>, %arg4: memref<16x32xf32, #tpu.memory_space<vmem>>, %arg5: memref<1x32xf32, #tpu.memory_space<vmem>>, %arg6: memref<32x32xf32, #tpu.memory_space<vmem>>, %arg7: memref<1x32xf32, #tpu.memory_space<vmem>>, %arg8: memref<32x32xf32, #tpu.memory_space<vmem>>, %arg9: memref<1x32xf32, #tpu.memory_space<vmem>>, %arg10: memref<16x32xf32, #tpu.memory_space<vmem>>) attributes {dimension_semantics = [#tpu.dimension_semantics<parallel>], iteration_bounds = array<i64: 3>, scalar_prefetch = 0 : i64, scratch_operands = 0 : i64, tpu.core_type = #tpu.core_type<tc>, window_params = [{pipeline_mode = #tpu.pipeline_mode<synchronous>, transform_indices = @transform_0, window_bounds = array<i64: 48, 16>}, {transform_indices = @transform_1, window_bounds = array<i64: 16, 16>}, {transform_indices = @transform_2, window_bounds = array<i64: 16, 48>}, {pipeline_mode = #tpu.pipeline_mode<synchronous>, transform_indices = @transform_3, window_bounds = array<i64: 16, 32>}, {pipeline_mode = #tpu.pipeline_mode<synchronous>, transform_indices = @transform_4, window_bounds = array<i64: 1, 32>}, {pipeline_mode = #tpu.pipeline_mode<synchronous>, transform_indices = @transform_5, window_bounds = array<i64: 32, 32>}, {pipeline_mode = #tpu.pipeline_mode<synchronous>, transform_indices = @transform_6, window_bounds = array<i64: 1, 32>}, {pipeline_mode = #tpu.pipeline_mode<synchronous>, transform_indices = @transform_7, window_bounds = array<i64: 32, 32>}, {pipeline_mode = #tpu.pipeline_mode<synchronous>, transform_indices = @transform_8, window_bounds = array<i64: 1, 32>}, {transform_indices = @transform_9, window_bounds = array<i64: 16, 32>}]} {
    %c0 = arith.constant 0 : index
    %c0_0 = arith.constant 0 : index
    %0 = vector.load %arg3[%c0, %c0_0] : memref<16x48xbf16, #tpu.memory_space<vmem>>, vector<16x48xbf16>
    %1 = arith.extf %0 : vector<16x48xbf16> to vector<16x48xf32>
    %c0_1 = arith.constant 0 : index
    %c0_2 = arith.constant 0 : index
    %2 = vector.load %arg2[%c0_1, %c0_2] : memref<16x16xf32, #tpu.memory_space<vmem>>, vector<16x16xf32>
    %c0_3 = arith.constant 0 : index
    %c0_4 = arith.constant 0 : index
    %3 = vector.load %arg1[%c0_3, %c0_4] : memref<48x16xf32, #tpu.memory_space<vmem>>, vector<48x16xf32>
    %cst = arith.constant dense<0.000000e+00> : vector<16x16xf32>
    %4 = tpu.matmul %1, %3, %cst {dimension_numbers = #tpu.dot_dimension_numbers<[1], [0], [0], [1], [0, 0, 1, 1], [], []>} : vector<16x48xf32>, vector<48x16xf32>, vector<16x16xf32> -> vector<16x16xf32>
    %5 = arith.addf %2, %4 : vector<16x16xf32>
    %c0_5 = arith.constant 0 : index
    %c0_6 = arith.constant 0 : index
    %6 = vector.load %arg4[%c0_5, %c0_6] : memref<16x32xf32, #tpu.memory_space<vmem>>, vector<16x32xf32>
    %cst_7 = arith.constant dense<0.000000e+00> : vector<16x32xf32>
    %7 = tpu.matmul %5, %6, %cst_7 {dimension_numbers = #tpu.dot_dimension_numbers<[1], [0], [0], [1], [0, 0, 1, 1], [], []>} : vector<16x16xf32>, vector<16x32xf32>, vector<16x32xf32> -> vector<16x32xf32>
    %c0_8 = arith.constant 0 : index
    %c0_9 = arith.constant 0 : index
    %8 = vector.load %arg5[%c0_8, %c0_9] : memref<1x32xf32, #tpu.memory_space<vmem>>, vector<1x32xf32>
    %9 = vector.broadcast %8 : vector<1x32xf32> to vector<16x32xf32>
    %10 = arith.addf %7, %9 : vector<16x32xf32>
    %cst_10 = arith.constant 0.000000e+00 : f32
    %11 = vector.broadcast %cst_10 : f32 to vector<16x32xf32>
    %12 = arith.maximumf %10, %11 : vector<16x32xf32>
    %c0_11 = arith.constant 0 : index
    %c0_12 = arith.constant 0 : index
    %13 = vector.load %arg6[%c0_11, %c0_12] : memref<32x32xf32, #tpu.memory_space<vmem>>, vector<32x32xf32>
    %cst_13 = arith.constant dense<0.000000e+00> : vector<16x32xf32>
    %14 = tpu.matmul %12, %13, %cst_13 {dimension_numbers = #tpu.dot_dimension_numbers<[1], [0], [0], [1], [0, 0, 1, 1], [], []>} : vector<16x32xf32>, vector<32x32xf32>, vector<16x32xf32> -> vector<16x32xf32>
    %c0_14 = arith.constant 0 : index
    %c0_15 = arith.constant 0 : index
    %15 = vector.load %arg7[%c0_14, %c0_15] : memref<1x32xf32, #tpu.memory_space<vmem>>, vector<1x32xf32>
    %16 = vector.broadcast %15 : vector<1x32xf32> to vector<16x32xf32>
    %17 = arith.addf %14, %16 : vector<16x32xf32>
    %cst_16 = arith.constant 0.000000e+00 : f32
    %18 = vector.broadcast %cst_16 : f32 to vector<16x32xf32>
    %19 = arith.maximumf %17, %18 : vector<16x32xf32>
    %c0_17 = arith.constant 0 : index
    %c0_18 = arith.constant 0 : index
    %20 = vector.load %arg8[%c0_17, %c0_18] : memref<32x32xf32, #tpu.memory_space<vmem>>, vector<32x32xf32>
    %cst_19 = arith.constant dense<0.000000e+00> : vector<16x32xf32>
    %21 = tpu.matmul %19, %20, %cst_19 {dimension_numbers = #tpu.dot_dimension_numbers<[1], [0], [0], [1], [0, 0, 1, 1], [], []>} : vector<16x32xf32>, vector<32x32xf32>, vector<16x32xf32> -> vector<16x32xf32>
    %c0_20 = arith.constant 0 : index
    %c0_21 = arith.constant 0 : index
    %22 = vector.load %arg9[%c0_20, %c0_21] : memref<1x32xf32, #tpu.memory_space<vmem>>, vector<1x32xf32>
    %23 = vector.broadcast %22 : vector<1x32xf32> to vector<16x32xf32>
    %24 = arith.addf %21, %23 : vector<16x32xf32>
    %cst_22 = arith.constant 0.000000e+00 : f32
    %25 = vector.broadcast %cst_22 : f32 to vector<16x32xf32>
    %26 = arith.maximumf %24, %25 : vector<16x32xf32>
    %c0_23 = arith.constant 0 : index
    %c0_24 = arith.constant 0 : index
    %27 = vector.load %arg10[%c0_23, %c0_24] : memref<16x32xf32, #tpu.memory_space<vmem>>, vector<16x32xf32>
    tpu.vector_store %arg10[%c0_23, %c0_24], %26 {strides = array<i32>} : memref<16x32xf32, #tpu.memory_space<vmem>>, vector<16x32xf32>,
    return
  }
  func.func @transform_0(%arg0: i32) -> (i32, i32) {
    %c0_i32 = arith.constant 0 : i32
    %c0_i32_0 = arith.constant 0 : i32
    %c0_i32_1 = arith.constant 0 : i32
    return %c0_i32, %c0_i32_0 : i32, i32
  }
  func.func @transform_1(%arg0: i32) -> (i32, i32) {
    %c0_i32 = arith.constant 0 : i32
    %c0_i32_0 = arith.constant 0 : i32
    return %arg0, %c0_i32 : i32, i32
  }
  func.func @transform_2(%arg0: i32) -> (i32, i32) {
    %c0_i32 = arith.constant 0 : i32
    %c0_i32_0 = arith.constant 0 : i32
    return %arg0, %c0_i32 : i32, i32
  }
  func.func @transform_3(%arg0: i32) -> (i32, i32) {
    %c0_i32 = arith.constant 0 : i32
    %c0_i32_0 = arith.constant 0 : i32
    %c0_i32_1 = arith.constant 0 : i32
    return %c0_i32, %c0_i32_0 : i32, i32
  }
  func.func @transform_4(%arg0: i32) -> (i32, i32) {
    %c0_i32 = arith.constant 0 : i32
    %c0_i32_0 = arith.constant 0 : i32
    %c0_i32_1 = arith.constant 0 : i32
    return %c0_i32, %c0_i32_0 : i32, i32
  }
  func.func @transform_5(%arg0: i32) -> (i32, i32) {
    %c0_i32 = arith.constant 0 : i32
    %c0_i32_0 = arith.constant 0 : i32
    %c0_i32_1 = arith.constant 0 : i32
    return %c0_i32, %c0_i32_0 : i32, i32
  }
  func.func @transform_6(%arg0: i32) -> (i32, i32) {
    %c0_i32 = arith.constant 0 : i32
    %c0_i32_0 = arith.constant 0 : i32
    %c0_i32_1 = arith.constant 0 : i32
    return %c0_i32, %c0_i32_0 : i32, i32
  }
  func.func @transform_7(%arg0: i32) -> (i32, i32) {
    %c0_i32 = arith.constant 0 : i32
    %c0_i32_0 = arith.constant 0 : i32
    %c0_i32_1 = arith.constant 0 : i32
    return %c0_i32, %c0_i32_0 : i32, i32
  }
  func.func @transform_8(%arg0: i32) -> (i32, i32) {
    %c0_i32 = arith.constant 0 : i32
    %c0_i32_0 = arith.constant 0 : i32
    %c0_i32_1 = arith.constant 0 : i32
    return %c0_i32, %c0_i32_0 : i32, i32
  }
  func.func @transform_9(%arg0: i32) -> (i32, i32) {
    %c0_i32 = arith.constant 0 : i32
    %c0_i32_0 = arith.constant 0 : i32
    return %arg0, %c0_i32 : i32, i32
  }
}

</mosaic_0001>

<bundles_post_ra>
// kernel: tpu_custom_call.1
= control target key start
LH: loop header
LB: loop body
LE: loop exit
PB: predicated region body
PF: predicated region fallthrough
CT: control target
= control target key end

     0   :  { %s683_s30 = smov 0   ;;  %s774_s0 = inlined_call_operand.vmem [shape: f32[48,16], index: 0, kind: input, shape index: {}]   ;;  %s775_s1 = inlined_call_operand.vmem [shape: f32[48,16], index: 1, kind: input, shape index: {}]   ;;  %s776_s2 = inlined_call_operand.vmem [shape: bf16[48,48], index: 2, kind: input, shape index: {}]   ;;  %s777_s3 = inlined_call_operand.vmem [shape: f32[16,32], index: 3, kind: input, shape index: {}]   ;;  %s778_s4 = inlined_call_operand.vmem [shape: f32[1,32], index: 4, kind: input, shape index: {}]   ;;  %s779_s5 = inlined_call_operand.vmem [shape: f32[32,32], index: 5, kind: input, shape index: {}]   ;;  %s780_s6 = inlined_call_operand.vmem [shape: f32[1,32], index: 6, kind: input, shape index: {}]   ;;  %s781_s7 = inlined_call_operand.vmem [shape: f32[32,32], index: 7, kind: input, shape index: {}]   ;;  %s782_s8 = inlined_call_operand.vmem [shape: f32[1,32], index: 8, kind: input, shape index: {}]   ;;  %s783_s9 = inlined_call_operand.vmem [shape: f32[48,32], index: 9, kind: output, shape index: {}]  }
   0x1 LB: > { %s589_s10 = sadd.s32 4294967295, %s631_s30   ;;  %p593_p0 = scmp.ge.s32.totalorder %s631_s30, 1  ;;  %s631_s30 = sphi %s683_s30, %s19_s30  }
   0x2   : > { %p299_p1 = scmp.lt.s32.totalorder %s631_s30, 4 }
   0x4   : > { %p300_p2 = pnand %p593_p0, %p299_p1 }
   0x5   : > { %s594_s15 = sshll.u32 (!%p300_p2), %s589_s10, 1 }
   0x6   : > { %303 = sbr.rel (%p300_p2) target bundleno = 562 (0x232), region = 56  ;;  %p341_p3 = scmp.lt.s32.totalorder (!%p300_p2), %s594_s15, 5 }
   0xb   : > { %v369_v0 = vld [vmem:[%s774_s0 + $0x28] sm:$0xff]  ;;  %v368_v1 = vld [vmem:[%s774_s0 + $0x20] sm:$0xff]  ;;  %v367_v2 = vld [vmem:[%s774_s0 + $0x18] sm:$0xff]  ;;  %s785_s15 = smov (!%p341_p3, %s594_s15), 5  ;;  %vm370_vm0 = vcmask 392192   ;;  %vm408_vm1 = vcmask 130048  }
   0xc   : > { %387 = vmatpush.msra.mxu0 %v369_v0  ;;  %v366_v3 = vld [vmem:[%s774_s0 + $0x10] sm:$0xff]  ;;  %s597_s20 = sshll.u32 %s785_s15, 2  ;;  %v365_v4 = vld [vmem:[%s774_s0 + $0x8] sm:$0xff]  ;;  %v364_v6 = vld [vmem:[%s774_s0] sm:$0xff]  ;;  %s595_s14 = sshll.u32 %s785_s15, 3  ;;  %vm448_vm2 = vcmask 261120  }
   0xd   : > { %s350_s25 = scalar_lea.vmem %s776_s2, %s597_s20  ;;  %v403_v9 = vld [vmem:[%s777_s3 + $0x8] sm:$0xff]  ;;  %v402_v10 = vld [vmem:[%s777_s3] sm:$0xff]  ;;  %v443_v11 = vld [vmem:[%s779_s5 + $0x18] sm:$0xff]  ;;  %s344_s18 = scalar_lea.vmem %s775_s1, %s595_s14 }
   0xe   : > { %388 = vmatpush.msra.mxu0 %v368_v1  ;;  %v611_v5 = vld [vmem:[%s350_s25] sm:$0xff]   ;;  %429 = vmatpush.msra.mxu1 %v403_v9  ;;  %v363_v15 = vld [vmem:[%s344_s18 + $0x8] sm:$0xff]  ;;  %v442_v18 = vld [vmem:[%s779_s5 + $0x10] sm:$0xff]  ;;  %s356_s23 = scalar_lea.vmem %s783_s9, %s595_s14 }
   0xf   : > { %v612_v7 = vunpack.c.l.bf16 %v611_v5  ;;  %v613_v8 = vunpack.c.h.bf16 %v611_v5  ;;  %467 = vmatpush.msra.mxu2 %v443_v11  ;;  %v362_v12 = vld [vmem:[%s344_s18] sm:$0xff]  ;;  %v441_v19 = vld [vmem:[%s779_s5 + $0x8] sm:$0xff]  ;;  %v483_v21 = vld [vmem:[%s781_s7 + $0x18] sm:$0xff] }
  0x10   : > { %389 = vmatpush.msra.mxu0 %v367_v2  ;;  %430 = vmatpush.msra.mxu1 %v402_v10  ;;  %v440_v20 = vld [vmem:[%s779_s5] sm:$0xff]  ;;  %v482_v29 = vld [vmem:[%s781_s7 + $0x10] sm:$0xff]  ;;  %v481_v30 = vld [vmem:[%s781_s7 + $0x8] sm:$0xff] }
  0x11   : > { %468 = vmatpush.msra.mxu2 %v442_v18  ;;  %506 = vmatpush.msra.mxu3 %v483_v21  ;;  %v622_v22 = vld [vmem:[%s778_s4] ss:$0 sm:$0xff] }
  0x12   : > { %390 = vmatpush.msra.mxu0 %v366_v3  ;;  %v480_v31 = vld [vmem:[%s781_s7] sm:$0xff] }
  0x13   : > { %469 = vmatpush.msra.mxu2 %v441_v19  ;;  %507 = vmatpush.msra.mxu3 %v482_v29  ;;  %v623_v32 = vld [vmem:[%s780_s6] ss:$0 sm:$0xff] }
  0x14   : > { %391 = vmatpush.msra.mxu0 %v365_v4  ;;  %v624_v39 = vld [vmem:[%s782_s8] ss:$0 sm:$0xff] }
  0x15   : > { %470 = vmatpush.msra.mxu2 %v440_v20  ;;  %508 = vmatpush.msra.mxu3 %v481_v30 }
  0x16   : > { %392 = vmatpush.msra.mxu0 %v364_v6 }
  0x17   : > { %600 = vmatmul.msk.f32.vlgmr.msra.gmra.mxu0 %vm370_vm0, %v612_v7  ;;  %509 = vmatpush.msra.mxu3 %v480_v31 }
  0x1f   : > { %601 = vmatmul.msk.f32.gmra.mxu0 %vm370_vm0, %v613_v8 }
  0x94   : > { %v394_v13 = vpop.f32.mrf.mxu0 }
  0x95   : > { %v400_v14 = vadd.f32 %v394_v13, %v362_v12 }
  0x97   : > { %602 = vmatmul.msk.f32.vlgmr.msra.gmra.mxu1 %vm408_vm1, %v400_v14 }
  0x9c   : > { %v397_v16 = vpop.f32.mrf.mxu0 }
  0x9d   : > { %v401_v17 = vadd.f32 %v397_v16, %v363_v15 }
  0x9f   : > { %603 = vmatmul.msk.f32.gmra.mxu1 %vm408_vm1, %v401_v17 }
 0x114   : > { %v432_v23 = vpop.f32.mrf.mxu1 }
 0x115   : > { %v433_v24 = vadd.f32 %v622_v22, %v432_v23 }
 0x117   : > { %v438_v25 = vmax.f32 %v433_v24, 0.0 }
 0x119   : > { %604 = vmatmul.msk.f32.vlgmr.msra.gmra.mxu2 %vm448_vm2, %v438_v25 }
 0x11c   : > { %v435_v26 = vpop.f32.mrf.mxu1 }
 0x11d   : > { %v436_v27 = vadd.f32 %v622_v22, %v435_v26 }
 0x11f   : > { %v439_v28 = vmax.f32 %v436_v27, 0.0 }
 0x121   : > { %605 = vmatmul.msk.f32.gmra.mxu2 %vm448_vm2, %v439_v28 }
 0x19c   : > { %v472_v33 = vpop.f32.mrf.mxu2 }
 0x19d   : > { %v473_v34 = vadd.f32 %v623_v32, %v472_v33 }
 0x19f   : > { %v478_v35 = vmax.f32 %v473_v34, 0.0 }
 0x1a1   : > { %606 = vmatmul.msk.f32.vlgmr.msra.gmra.mxu3 %vm448_vm2, %v478_v35 }
 0x1a4   : > { %v475_v36 = vpop.f32.mrf.mxu2 }
 0x1a5   : > { %v476_v37 = vadd.f32 %v623_v32, %v475_v36 }
 0x1a7   : > { %v479_v38 = vmax.f32 %v476_v37, 0.0 }
 0x1a9   : > { %607 = vmatmul.msk.f32.gmra.mxu3 %vm448_vm2, %v479_v38 }
 0x224   : > { %v511_v40 = vpop.f32.mrf.mxu3 }
 0x225   : > { %v512_v41 = vadd.f32 %v624_v39, %v511_v40 }
 0x227   : > { %v517_v42 = vmax.f32 %v512_v41, 0.0 }
 0x229   : > { %519 = vst.msk [vmem:[%s356_s23] sm:$0xff] %vm448_vm2, %v517_v42 }
 0x22c   : > { %v514_v43 = vpop.f32.mrf.mxu3 }
 0x22d   : > { %v515_v44 = vadd.f32 %v624_v39, %v514_v43 }
 0x22f   : > { %v518_v45 = vmax.f32 %v515_v44, 0.0 }
 0x231   : > { %520 = vst.msk [vmem:[%s356_s23 + $0x8] sm:$0xff] %vm448_vm2, %v518_v45 }
 0x232 PF: > { %s19_s30 = sadd.s32 1, %s631_s30  }
 0x233   : > { %p16_p4 = scmp.ge.s32.totalorder %s19_s30, 5  }
 0x235   :  { %18 = sbr.rel (!%p16_p4) target bundleno = 1 (0x1), region = 89 }

</bundles_post_ra>
